<compile_context>
chip_gen: v6e
topology: v6e:2x2x1
jax: 0.10.0
libtpu: 0.0.40
codegen_flags: <defaults>
</compile_context>

<pallas_src>
import jax
import jax.numpy as jnp
from jax.experimental import pallas as pl
from jax.experimental.pallas import tpu as pltpu

_VMEM_LIMIT_BYTES = 32 * 1024 * 1024
_SINGLE_BUFFER_OK = None  # lazily probed


def _round_up(x, m):
    return ((x + m - 1) // m) * m


def _pick_tm(m, cap=256):
    """Row-tile from the actual row count: minimal padding for tiny M,
    >=2 grid steps (v7x megacore) and <=cap rows per step for large M."""
    if m <= 32:
        return _round_up(max(m, 8), 8)
    return min(cap, _round_up(pl.cdiv(m, 2), 32))


# ---------------------------------------------------------------------------
# pipeline_mode=pl.Buffered(1) support probe: grid-invariant operands only need
# one VMEM buffer; default double-buffering doubles resident weight bytes.
# ---------------------------------------------------------------------------
def _probe_kernel(x_ref, w_ref, o_ref):
    o_ref[...] = x_ref[...] + w_ref[...]


def _single_buffer_weights_ok():
    global _SINGLE_BUFFER_OK
    if _SINGLE_BUFFER_OK is not None:
        return _SINGLE_BUFFER_OK
    try:
        w_spec = pl.BlockSpec((8, 128), lambda i: (0, 0),
                              pipeline_mode=pl.Buffered(1))
        fn = pl.pallas_call(
            _probe_kernel,
            out_shape=jax.ShapeDtypeStruct((8, 128), jnp.float32),
            grid_spec=pltpu.PrefetchScalarGridSpec(
                num_scalar_prefetch=0,
                grid=(1,),
                in_specs=[pl.BlockSpec((8, 128), lambda i: (0, 0)), w_spec],
                out_specs=pl.BlockSpec((8, 128), lambda i: (0, 0)),
            ),
        )
        z = jnp.zeros((8, 128), jnp.float32)
        jax.block_until_ready(fn(z, z))
        _SINGLE_BUFFER_OK = True
    except Exception:
        _SINGLE_BUFFER_OK = False
    return _SINGLE_BUFFER_OK


def _const_spec(shape):
    """BlockSpec for a grid-invariant (weight/bias) operand: constant index_map,
    single-buffered when supported."""
    imap = lambda *_: (0,) * len(shape)
    if _single_buffer_weights_ok():
        return pl.BlockSpec(shape, imap, pipeline_mode=pl.Buffered(1))
    return pl.BlockSpec(shape, imap)


# ---------------------------------------------------------------------------
# Fused kernels. MXU operands are cast to bf16 in-kernel; accumulation f32.
# ---------------------------------------------------------------------------
def _enc_proj_kernel(x_ref, ew_ref, eb_ref, pw_ref, pb_ref, o_ref):
    """One row-tile of:  o = tanh(x @ We + be) @ Wp + bp."""
    x = x_ref[...]                                             # f32 rows
    h = jnp.dot(x.astype(jnp.bfloat16), ew_ref[...],
                preferred_element_type=jnp.float32)
    h = jnp.tanh(h + eb_ref[...])                              # tanh -> EUP slot
    y = jnp.dot(h.astype(jnp.bfloat16), pw_ref[...],
                preferred_element_type=jnp.float32)
    o_ref[...] = (y + pb_ref[...]).astype(o_ref.dtype)


def _embed_ffn_kernel(ids_ref, tbl_ref, w1_ref, b1_ref, w2_ref, b2_ref,
                      o_ref, emb_ref):
    """One row-tile of:  x = table[ids];  o = relu(x @ W1 + b1) @ W2 + b2 + x."""
    tm = o_ref.shape[0]
    base = pl.program_id(0) * tm
    # Row gather: ids live in SMEM (scalar prefetch), table is VMEM-resident;
    # the gathered [tm, D] embedding stays in VMEM (never written back to HBM).
    for r in range(tm):                 # static trip count; dynamic source row
        emb_ref[r:r + 1, :] = tbl_ref[pl.ds(ids_ref[base + r], 1), :]
    x = emb_ref[...]                                           # f32 (true residual)
    h = jnp.dot(x.astype(jnp.bfloat16), w1_ref[...],
                preferred_element_type=jnp.float32)
    h = jnp.maximum(h + b1_ref[...], 0.0)
    y = jnp.dot(h.astype(jnp.bfloat16), w2_ref[...],
                preferred_element_type=jnp.float32)
    o_ref[...] = (y + b2_ref[...] + x).astype(o_ref.dtype)


# ---------------------------------------------------------------------------
# Wrappers.
# ---------------------------------------------------------------------------
def fused_encoder_proj(x, enc_w, enc_b, proj_w, proj_b):
    """x: [M, FEAT] f32 -> [M, D_BERT] f32 via one fused (enc tanh + proj) kernel."""
    M, din = x.shape
    dmid = enc_w.shape[1]
    dout = proj_w.shape[1]
    tm = _pick_tm(M)
    m_pad = _round_up(M, tm)
    if m_pad != M:
        x = jnp.pad(x, ((0, m_pad - M), (0, 0)))
    out = pl.pallas_call(
        _enc_proj_kernel,
        out_shape=jax.ShapeDtypeStruct((m_pad, dout), jnp.float32),
        grid_spec=pltpu.PrefetchScalarGridSpec(
            num_scalar_prefetch=0,
            grid=(m_pad // tm,),
            in_specs=[
                pl.BlockSpec((tm, din), lambda i: (i, 0)),
                _const_spec((din, dmid)),
                _const_spec((1, dmid)),
                _const_spec((dmid, dout)),
                _const_spec((1, dout)),
            ],
            out_specs=pl.BlockSpec((tm, dout), lambda i: (i, 0)),
        ),
        compiler_params=pltpu.CompilerParams(
            dimension_semantics=("parallel",),
            vmem_limit_bytes=_VMEM_LIMIT_BYTES),
    )(x, enc_w, enc_b, proj_w, proj_b)
    return out[:M]


def fused_embed_ffn(ids, table, w1, b1, w2, b2):
    """ids: [M] int32 -> relu(table[ids]@W1+b1)@W2+b2 + table[ids], [M, D] f32."""
    M = ids.shape[0]
    n_words, d = table.shape
    dff = w1.shape[1]
    tm = _pick_tm(M)
    m_pad = _round_up(M, tm)
    if m_pad != M:
        ids = jnp.pad(ids, (0, m_pad - M))   # padded rows gather row 0; sliced off
    out = pl.pallas_call(
        _embed_ffn_kernel,
        out_shape=jax.ShapeDtypeStruct((m_pad, d), jnp.float32),
        grid_spec=pltpu.PrefetchScalarGridSpec(
            num_scalar_prefetch=1,                       # ids -> SMEM
            grid=(m_pad // tm,),
            in_specs=[
                _const_spec((n_words, d)),   # TODO(synk): per-row DMA gather for the real 21128x768 table
                _const_spec((d, dff)),
                _const_spec((1, dff)),
                _const_spec((dff, d)),
                _const_spec((1, d)),
            ],
            out_specs=pl.BlockSpec((tm, d), lambda i, ids_ref: (i, 0)),
            scratch_shapes=[pltpu.VMEM((tm, d), jnp.float32)],
        ),
        compiler_params=pltpu.CompilerParams(
            dimension_semantics=("parallel",),
            vmem_limit_bytes=_VMEM_LIMIT_BYTES),
    )(ids.astype(jnp.int32), table, w1, b1, w2, b2)
    return out[:M]


# ---------------------------------------------------------------------------
# Parameter initialization (deterministic, synthetic). Weights stored bf16 once.
# ---------------------------------------------------------------------------
def init_params(key, *, feat_dim, d_model, d_bert, d_ff, n_words):
    ks = jax.random.split(key, 5)
    scale = 0.02
    f32, bf16 = jnp.float32, jnp.bfloat16
    return {
        # stand-in for ctc_model.encoder (single linear + tanh)
        "enc_w": (scale * jax.random.normal(ks[0], (feat_dim, d_model), f32)).astype(bf16),
        "enc_b": jnp.zeros((1, d_model), f32),
        # ctc_model.proj_mlp
        "proj_w": (scale * jax.random.normal(ks[1], (d_model, d_bert), f32)).astype(bf16),
        "proj_b": jnp.zeros((1, d_bert), f32),
        # stand-in for TransformerEmbedding(bert): embedding table + FFN w/ residual
        "bert_table": scale * jax.random.normal(ks[2], (n_words, d_bert), f32),
        "bert_w1": (scale * jax.random.normal(ks[3], (d_bert, d_ff), f32)).astype(bf16),
        "bert_b1": jnp.zeros((1, d_ff), f32),
        "bert_w2": (scale * jax.random.normal(ks[4], (d_ff, d_bert), f32)).astype(bf16),
        "bert_b2": jnp.zeros((1, d_bert), f32),
    }


# ---------------------------------------------------------------------------
# CTCBertModel.forward  (use_lstm_predictor=False, bert_insert_blank=True)
# ---------------------------------------------------------------------------
def ctc_bert_forward(params, speech, speech_lengths, text, text_lengths,
                     bert_input, *, bert_blank_idx=1, bert_insert_blank=True):
    assert text_lengths.ndim == 1
    assert (speech.shape[0] == speech_lengths.shape[0]
            == text.shape[0] == text_lengths.shape[0])

    B, T, feat = speech.shape
    d_bert = params["proj_w"].shape[1]

    # --- speech branch -------------------------------------------------------
    # TODO(synk): init_ctc_model / conformer configs are not provided; the speech
    # encoder is a single linear+tanh stand-in (no temporal subsampling), fused
    # with proj_mlp in one pallas_call.
    enc_proj = fused_encoder_proj(
        speech.reshape(B * T, feat),
        params["enc_w"], params["enc_b"], params["proj_w"], params["proj_b"])
    encoder_out = enc_proj.reshape(B, T, d_bert)

    t_idx = jnp.arange(T, dtype=jnp.int32)[None, :]
    encoder_mask = (t_idx < speech_lengths[:, None])[:, None, :]       # [B, 1, T]
    encoder_out_lens = jnp.squeeze(encoder_mask, 1).sum(1).astype(jnp.int32)

    # --- text branch (not use_lstm_predictor) --------------------------------
    # TODO(synk): BiLSTMPredictor / VariationalLSTM path (use_lstm_predictor=True)
    # is not implemented (VariationalLSTM definition is external).
    Bn, N = bert_input.shape
    # Blank token rides along as one extra row of the same fused embed+FFN call.
    ids_flat = jnp.concatenate(
        [bert_input.reshape(-1).astype(jnp.int32),
         jnp.array([bert_blank_idx], dtype=jnp.int32)])
    bert_rows = fused_embed_ffn(
        ids_flat, params["bert_table"],
        params["bert_w1"], params["bert_b1"],
        params["bert_w2"], params["bert_b2"])                          # [B*N+1, D]
    text_coder_out = bert_rows[:Bn * N].reshape(Bn, N, d_bert)
    txt_out = text_coder_out

    if bert_insert_blank:
        # TODO(synk): get_embed semantics of the external TransformerEmbedding are
        # unknown; here the blank goes through the same embed+FFN stand-in path.
        blank_embed = bert_rows[Bn * N]                                # [D]
        blank_b = jnp.broadcast_to(blank_embed[None, None, :], (Bn, N, d_bert))
        # stack+reshape interleave (t0, b, t1, b, ...), then drop the leading
        # token and trailing blank -> matches n_txtcoder_out[:, 1:] of the ref.
        interleaved = jnp.stack([text_coder_out, blank_b], axis=2)
        interleaved = interleaved.reshape(Bn, 2 * N, d_bert)
        txt_out = interleaved[:, 1:2 * N - 1]                          # [B, 2N-2, D]

    return encoder_out, encoder_out_lens, txt_out


# ---------------------------------------------------------------------------
# main
# ---------------------------------------------------------------------------
if __name__ == "__main__":
    # Small shapes; feature dims are 128-multiples (D_FF a 256-multiple).
    B = 2            # batch
    T = 16           # speech frames
    FEAT = 128       # speech feature dim
    D_MODEL = 128    # encoder hidden
    D_BERT = 128     # bert_embed.n_out (scaled down from 768)
    D_FF = 256       # feed-forward hidden
    N_WORDS = 64     # vocab (scaled down from 21128)
    N = 8            # bert_input length

    key = jax.random.PRNGKey(0)
    k_param, k_speech, k_bert, k_text = jax.random.split(key, 4)

    params = init_params(k_param, feat_dim=FEAT, d_model=D_MODEL,
                         d_bert=D_BERT, d_ff=D_FF, n_words=N_WORDS)

    speech = jax.random.normal(k_speech, (B, T, FEAT), jnp.float32)
    speech_lengths = jnp.array([T, T - 4], dtype=jnp.int32)
    text = jax.random.randint(k_text, (B, 6), 2, N_WORDS, dtype=jnp.int32)
    text_lengths = jnp.array([6, 5], dtype=jnp.int32)
    bert_input = jax.random.randint(k_bert, (B, N), 2, N_WORDS, dtype=jnp.int32)

    encoder_out, encoder_out_lens, txt_out = ctc_bert_forward(
        params, speech, speech_lengths, text, text_lengths, bert_input,
        bert_blank_idx=1, bert_insert_blank=True)
    jax.block_until_ready((encoder_out, encoder_out_lens, txt_out))

    # Shape checks.
    assert encoder_out.shape == (B, T, D_BERT), encoder_out.shape
    assert encoder_out_lens.shape == (B,), encoder_out_lens.shape
    assert txt_out.shape == (B, 2 * N - 2, D_BERT), txt_out.shape
    assert bool(jnp.all(jnp.isfinite(encoder_out)))
    assert bool(jnp.all(jnp.isfinite(txt_out)))

    # Pure-JAX reference (f32 math on the same bf16-stored weights).
    ew = params["enc_w"].astype(jnp.float32)
    pw = params["proj_w"].astype(jnp.float32)
    w1 = params["bert_w1"].astype(jnp.float32)
    w2 = params["bert_w2"].astype(jnp.float32)
    ref_enc = jnp.tanh(speech @ ew + params["enc_b"]) @ pw + params["proj_b"]

    def _ffn_ref(x):
        return jnp.maximum(x @ w1 + params["bert_b1"], 0.0) @ w2 + params["bert_b2"] + x

    emb = jnp.take(params["bert_table"], bert_input, axis=0)
    ref_txt = _ffn_ref(emb)
    ref_blank = _ffn_ref(params["bert_table"][1][None, :])[0]
    inter = jnp.stack([ref_txt, jnp.broadcast_to(ref_blank, ref_txt.shape)], axis=2)
    inter = inter.reshape(B, 2 * N, D_BERT)
    ref_txt_out = inter[:, 1:2 * N - 1]

    assert bool(jnp.allclose(encoder_out, ref_enc, atol=2e-2, rtol=2e-2)), \
        float(jnp.max(jnp.abs(encoder_out - ref_enc)))
    assert bool(jnp.allclose(txt_out, ref_txt_out, atol=2e-2, rtol=2e-2)), \
        float(jnp.max(jnp.abs(txt_out - ref_txt_out)))

    print("KERNEL_OK")
</pallas_src>

<mosaic_0001>
module attributes {stable_mosaic.version = 11 : i64} {
  func.func @_probe_kernel(%arg0: i32, %arg1: memref<8x128xf32, #tpu.memory_space<vmem>>, %arg2: memref<8x128xf32, #tpu.memory_space<vmem>>, %arg3: memref<8x128xf32, #tpu.memory_space<vmem>>) attributes {dimension_semantics = [#tpu.dimension_semantics<arbitrary>], iteration_bounds = array<i64: 1>, scalar_prefetch = 0 : i64, scratch_operands = 0 : i64, tpu.core_type = #tpu.core_type<tc>, window_params = [{pipeline_mode = #tpu.pipeline_mode<synchronous>, transform_indices = @transform_0, window_bounds = array<i64: 8, 128>}, {pipeline_mode = #tpu.pipeline_mode<synchronous>, transform_indices = @transform_1, window_bounds = array<i64: 8, 128>}, {pipeline_mode = #tpu.pipeline_mode<synchronous>, transform_indices = @transform_2, window_bounds = array<i64: 8, 128>}]} {
    %c0 = arith.constant 0 : index
    %c0_0 = arith.constant 0 : index
    %0 = vector.load %arg1[%c0, %c0_0] : memref<8x128xf32, #tpu.memory_space<vmem>>, vector<8x128xf32>
    %c0_1 = arith.constant 0 : index
    %c0_2 = arith.constant 0 : index
    %1 = vector.load %arg2[%c0_1, %c0_2] : memref<8x128xf32, #tpu.memory_space<vmem>>, vector<8x128xf32>
    %2 = arith.addf %0, %1 : vector<8x128xf32>
    %c0_3 = arith.constant 0 : index
    %c0_4 = arith.constant 0 : index
    %3 = vector.load %arg3[%c0_3, %c0_4] : memref<8x128xf32, #tpu.memory_space<vmem>>, vector<8x128xf32>
    tpu.vector_store %arg3[%c0_3, %c0_4], %2 {strides = array<i32>} : memref<8x128xf32, #tpu.memory_space<vmem>>, vector<8x128xf32>,
    return
  }
  func.func @transform_0(%arg0: i32) -> (i32, i32) {
    %c0_i32 = arith.constant 0 : i32
    %c0_i32_0 = arith.constant 0 : i32
    %c0_i32_1 = arith.constant 0 : i32
    return %c0_i32, %c0_i32_0 : i32, i32
  }
  func.func @transform_1(%arg0: i32) -> (i32, i32) {
    %c0_i32 = arith.constant 0 : i32
    %c0_i32_0 = arith.constant 0 : i32
    %c0_i32_1 = arith.constant 0 : i32
    return %c0_i32, %c0_i32_0 : i32, i32
  }
  func.func @transform_2(%arg0: i32) -> (i32, i32) {
    %c0_i32 = arith.constant 0 : i32
    %c0_i32_0 = arith.constant 0 : i32
    %c0_i32_1 = arith.constant 0 : i32
    return %c0_i32, %c0_i32_0 : i32, i32
  }
}

module attributes {stable_mosaic.version = 11 : i64} {
  func.func @_enc_proj_kernel(%arg0: i32, %arg1: memref<32x128xf32, #tpu.memory_space<vmem>>, %arg2: memref<128x128xbf16, #tpu.memory_space<vmem>>, %arg3: memref<1x128xf32, #tpu.memory_space<vmem>>, %arg4: memref<128x128xbf16, #tpu.memory_space<vmem>>, %arg5: memref<1x128xf32, #tpu.memory_space<vmem>>, %arg6: memref<32x128xf32, #tpu.memory_space<vmem>>) attributes {dimension_semantics = [#tpu.dimension_semantics<parallel>], iteration_bounds = array<i64: 1>, scalar_prefetch = 0 : i64, scratch_operands = 0 : i64, tpu.core_type = #tpu.core_type<tc>, window_params = [{transform_indices = @transform_0, window_bounds = array<i64: 32, 128>}, {pipeline_mode = #tpu.pipeline_mode<synchronous>, transform_indices = @transform_1, window_bounds = array<i64: 128, 128>}, {pipeline_mode = #tpu.pipeline_mode<synchronous>, transform_indices = @transform_2, window_bounds = array<i64: 1, 128>}, {pipeline_mode = #tpu.pipeline_mode<synchronous>, transform_indices = @transform_3, window_bounds = array<i64: 128, 128>}, {pipeline_mode = #tpu.pipeline_mode<synchronous>, transform_indices = @transform_4, window_bounds = array<i64: 1, 128>}, {transform_indices = @transform_5, window_bounds = array<i64: 32, 128>}]} {
    %c0 = arith.constant 0 : index
    %c0_0 = arith.constant 0 : index
    %0 = vector.load %arg1[%c0, %c0_0] : memref<32x128xf32, #tpu.memory_space<vmem>>, vector<32x128xf32>
    %1 = arith.truncf %0 : vector<32x128xf32> to vector<32x128xbf16>
    %c0_1 = arith.constant 0 : index
    %c0_2 = arith.constant 0 : index
    %2 = vector.load %arg2[%c0_1, %c0_2] : memref<128x128xbf16, #tpu.memory_space<vmem>>, vector<128x128xbf16>
    %cst = arith.constant dense<0.000000e+00> : vector<32x128xf32>
    %3 = tpu.matmul %1, %2, %cst {dimension_numbers = #tpu.dot_dimension_numbers<[1], [0], [0], [1], [0, 0, 1, 1], [], []>} : vector<32x128xbf16>, vector<128x128xbf16>, vector<32x128xf32> -> vector<32x128xf32>
    %c0_3 = arith.constant 0 : index
    %c0_4 = arith.constant 0 : index
    %4 = vector.load %arg3[%c0_3, %c0_4] : memref<1x128xf32, #tpu.memory_space<vmem>>, vector<1x128xf32>
    %5 = vector.broadcast %4 : vector<1x128xf32> to vector<32x128xf32>
    %6 = arith.addf %3, %5 : vector<32x128xf32>
    %7 = math.tanh %6 : vector<32x128xf32>
    %8 = arith.truncf %7 : vector<32x128xf32> to vector<32x128xbf16>
    %c0_5 = arith.constant 0 : index
    %c0_6 = arith.constant 0 : index
    %9 = vector.load %arg4[%c0_5, %c0_6] : memref<128x128xbf16, #tpu.memory_space<vmem>>, vector<128x128xbf16>
    %cst_7 = arith.constant dense<0.000000e+00> : vector<32x128xf32>
    %10 = tpu.matmul %8, %9, %cst_7 {dimension_numbers = #tpu.dot_dimension_numbers<[1], [0], [0], [1], [0, 0, 1, 1], [], []>} : vector<32x128xbf16>, vector<128x128xbf16>, vector<32x128xf32> -> vector<32x128xf32>
    %c0_8 = arith.constant 0 : index
    %c0_9 = arith.constant 0 : index
    %11 = vector.load %arg5[%c0_8, %c0_9] : memref<1x128xf32, #tpu.memory_space<vmem>>, vector<1x128xf32>
    %12 = vector.broadcast %11 : vector<1x128xf32> to vector<32x128xf32>
    %13 = arith.addf %10, %12 : vector<32x128xf32>
    %c0_10 = arith.constant 0 : index
    %c0_11 = arith.constant 0 : index
    %14 = vector.load %arg6[%c0_10, %c0_11] : memref<32x128xf32, #tpu.memory_space<vmem>>, vector<32x128xf32>
    tpu.vector_store %arg6[%c0_10, %c0_11], %13 {strides = array<i32>} : memref<32x128xf32, #tpu.memory_space<vmem>>, vector<32x128xf32>,
    return
  }
  func.func @transform_0(%arg0: i32) -> (i32, i32) {
    %c0_i32 = arith.constant 0 : i32
    %c0_i32_0 = arith.constant 0 : i32
    return %arg0, %c0_i32 : i32, i32
  }
  func.func @transform_1(%arg0: i32) -> (i32, i32) {
    %c0_i32 = arith.constant 0 : i32
    %c0_i32_0 = arith.constant 0 : i32
    %c0_i32_1 = arith.constant 0 : i32
    return %c0_i32, %c0_i32_0 : i32, i32
  }
  func.func @transform_2(%arg0: i32) -> (i32, i32) {
    %c0_i32 = arith.constant 0 : i32
    %c0_i32_0 = arith.constant 0 : i32
    %c0_i32_1 = arith.constant 0 : i32
    return %c0_i32, %c0_i32_0 : i32, i32
  }
  func.func @transform_3(%arg0: i32) -> (i32, i32) {
    %c0_i32 = arith.constant 0 : i32
    %c0_i32_0 = arith.constant 0 : i32
    %c0_i32_1 = arith.constant 0 : i32
    return %c0_i32, %c0_i32_0 : i32, i32
  }
  func.func @transform_4(%arg0: i32) -> (i32, i32) {
    %c0_i32 = arith.constant 0 : i32
    %c0_i32_0 = arith.constant 0 : i32
    %c0_i32_1 = arith.constant 0 : i32
    return %c0_i32, %c0_i32_0 : i32, i32
  }
  func.func @transform_5(%arg0: i32) -> (i32, i32) {
    %c0_i32 = arith.constant 0 : i32
    %c0_i32_0 = arith.constant 0 : i32
    return %arg0, %c0_i32 : i32, i32
  }
}

</mosaic_0001>

<bundles_post_ra>
// kernel: tpu_custom_call.1
= control target key start
LH: loop header
LB: loop body
LE: loop exit
PB: predicated region body
PF: predicated region fallthrough
CT: control target
= control target key end

     0   :  { %7 = vsyncpa [#allocation3], 0  ;;  %s152_s0 = inlined_call_operand.hbm [shape: f32[8,128], index: 0, kind: input, shape index: {}]   ;;  %s153_s1 = inlined_call_operand.hbm [shape: f32[8,128], index: 1, kind: input, shape index: {}]   ;;  %s154_s2 = inlined_call_operand.hbm [shape: f32[8,128], index: 2, kind: output, shape index: {}]  }
   0x1   :  { %8 = vsyncpa [#allocation6], 0 }
   0x2   :  { %9 = vsyncpa [#allocation4], 0  ;;  %s125_s9 = smov [#allocation2]   ;;  %s126_s11 = smov [#allocation5]  }
   0x3   :  { %s16_s10 = sshll.u32 %s125_s9, 4  ;;  %s26_s12 = sshll.u32 %s126_s11, 4  ;;  %s17_s10 = int_to_ptr.vmem [resolvable:$true] %s16_s10  ;;  %s27_s12 = int_to_ptr.vmem [resolvable:$true] %s26_s12 }
   0x4   :  { %s67_s13 = scalar_lea.vmem %s17_s10, 128  ;;  %p72_p1 = scmp.lt.s32.totalorder %s17_s10, %s17_s10 }
   0x5   :  { %p68_p0 = scmp.ne.s32.totalorder %s17_s10, %s67_s13  ;;  %p73_p2 = scmp.lt.s32.totalorder %s67_s13, %s67_s13 }
   0x7   :  { %p74_p3 = por %p73_p2, %p72_p1 }
   0x9   :  { %p75_p4 = pnand %p74_p3, %p68_p0 }
   0xb   :  { %78 = shalt.err (!%p75_p4)
}
   0xc   :  { %19 = dma.hbm_to_vmem [thread:$0]  %s152_s0, 128, %s17_s10, [#allocation3]  }
   0xd   :  { %s87_s16 = scalar_lea.vmem %s27_s12, 128  ;;  %p92_p6 = scmp.lt.s32.totalorder %s27_s12, %s27_s12 }
   0xe   :  { %p88_p5 = scmp.ne.s32.totalorder %s27_s12, %s87_s16  ;;  %p93_p7 = scmp.lt.s32.totalorder %s87_s16, %s87_s16 }
  0x10   :  { %p94_p8 = por %p93_p7, %p92_p6 }
  0x12   :  { %p95_p9 = pnand %p94_p8, %p88_p5 }
  0x14   :  { %98 = shalt.err (!%p95_p9)
}
  0x15   :  { %29 = dma.hbm_to_vmem [thread:$0]  %s153_s1, 128, %s27_s12, [#allocation6]  }
  0x16   :  { %119 = dma.done.wait [#allocation3], 128  }
  0x17   :  { %120 = vsyncadd [#allocation3], 4294967168 }
  0x18   :  { %121 = dma.done.wait [#allocation6], 128  }
  0x19   :  { %122 = vsyncadd [#allocation6], 4294967168  ;;  %s127_s19 = smov [#allocation7]   ;;  %v36_v0 = vld [vmem:[#allocation2] sm:$0xff]  ;;  %v37_v1 = vld [vmem:[#allocation5] sm:$0xff] }
  0x1a   :  { %s46_s20 = sshll.u32 %s127_s19, 4  ;;  %v38_v2 = vadd.f32 %v37_v1, %v36_v0  ;;  %s47_s20 = int_to_ptr.vmem [resolvable:$true] %s46_s20 }
  0x1b   :  { %s99_s0 = scalar_lea.vmem %s47_s20, 128  ;;  %p104_p11 = scmp.lt.s32.totalorder %s47_s20, %s47_s20 }
  0x1c   :  { %39 = vst [vmem:[#allocation7] sm:$0xff] %v38_v2  ;;  %p100_p10 = scmp.ne.s32.totalorder %s47_s20, %s99_s0  ;;  %p105_p12 = scmp.lt.s32.totalorder %s99_s0, %s99_s0 }
  0x1e   :  { %p106_p13 = por %p105_p12, %p104_p11 }
  0x20   :  { %p107_p0 = pnand %p106_p13, %p100_p10 }
  0x22   :  { %110 = shalt.err (!%p107_p0)
}
  0x23   :  { %49 = dma.vmem_to_hbm [thread:$0]  %s47_s20, 128, %s154_s2, [#allocation4]  }
  0x24   :  { %123 = dma.done.wait [#allocation4], 128  }
  0x25   :  { %124 = vsyncadd [#allocation4], 4294967168 }
  0x26   :  { %53 = vsyncpa [#allocation3], 1 }
  0x27   :  { %54 = vsyncpa [#allocation6], 1 }
  0x28   :  { %55 = vsyncpa [#allocation4], 1 }

// kernel: tpu_custom_call.1
= control target key start
LH: loop header
LB: loop body
LE: loop exit
PB: predicated region body
PF: predicated region fallthrough
CT: control target
= control target key end

     0   :  { %10 = vsyncpa [#allocation3], 0  ;;  %s595_s0 = inlined_call_operand.hbm [shape: f32[32,128], index: 0, kind: input, shape index: {}]   ;;  %s596_s1 = inlined_call_operand.hbm [shape: bf16[128,128], index: 1, kind: input, shape index: {}]   ;;  %s597_s2 = inlined_call_operand.vmem [shape: f32[1,128], index: 2, kind: input, shape index: {}]   ;;  %s598_s3 = inlined_call_operand.hbm [shape: bf16[128,128], index: 3, kind: input, shape index: {}]   ;;  %s599_s4 = inlined_call_operand.vmem [shape: f32[1,128], index: 4, kind: input, shape index: {}]   ;;  %s600_s5 = inlined_call_operand.hbm [shape: f32[32,128], index: 5, kind: output, shape index: {}]  }
   0x1   :  { %11 = vsyncpa [#allocation6], 0 }
   0x2   :  { %12 = vsyncpa [#allocation4], 0  ;;  %s533_s18 = smov [#allocation5]  }
   0x3   :  { %s30_s19 = sshll.u32 %s533_s18, 4  ;;  %s31_s19 = int_to_ptr.vmem [resolvable:$true] %s30_s19 }
   0x4   :  { %s455_s20 = scalar_lea.vmem %s31_s19, 1024  ;;  %p460_p1 = scmp.lt.s32.totalorder %s31_s19, %s31_s19 }
   0x5   :  { %p456_p0 = scmp.ne.s32.totalorder %s31_s19, %s455_s20  ;;  %p461_p2 = scmp.lt.s32.totalorder %s455_s20, %s455_s20 }
   0x7   :  { %p462_p3 = por %p461_p2, %p460_p1 }
   0x9   :  { %p463_p4 = pnand %p462_p3, %p456_p0 }
   0xb   :  { %466 = shalt.err (!%p463_p4)
}
   0xc   :  { %s534_s21 = smov 64   ;;  %s535_s22 = smov 4  }
   0xd   :  { %36 = dma.hbm_to_vmem [thread:$0]  %s596_s1, 1024, %s31_s19, [#allocation6], %s534_s21, %s534_s21, %s535_s22  }
   0xe   :  { %s536_s25 = smov [#allocation2]  }
   0xf   :  { %s18_s26 = sshll.u32 %s536_s25, 4  ;;  %s19_s26 = int_to_ptr.vmem [resolvable:$true] %s18_s26 }
  0x10   :  { %s475_s27 = scalar_lea.vmem %s19_s26, 512  ;;  %p480_p6 = scmp.lt.s32.totalorder %s19_s26, %s19_s26 }
  0x11   :  { %p476_p5 = scmp.ne.s32.totalorder %s19_s26, %s475_s27  ;;  %p481_p7 = scmp.lt.s32.totalorder %s475_s27, %s475_s27 }
  0x13   :  { %p482_p8 = por %p481_p7, %p480_p6 }
  0x15   :  { %p483_p9 = pnand %p482_p8, %p476_p5 }
  0x17   :  { %486 = shalt.err (!%p483_p9)
}
  0x18   :  { %s537_s28 = smov 128   ;;  %s538_s29 = smov 8  }
  0x19   :  { %24 = dma.hbm_to_vmem [thread:$0]  %s595_s0, 512, %s19_s26, [#allocation3], %s537_s28, %s537_s28, %s538_s29  }
  0x1a   :  { %s539_s1 = smov [#allocation7]  }
  0x1b   :  { %s44_s7 = sshll.u32 %s539_s1, 4  ;;  %s45_s7 = int_to_ptr.vmem [resolvable:$true] %s44_s7 }
  0x1c   :  { %s495_s8 = scalar_lea.vmem %s45_s7, 1024  ;;  %p500_p11 = scmp.lt.s32.totalorder %s45_s7, %s45_s7 }
  0x1d   :  { %p496_p10 = scmp.ne.s32.totalorder %s45_s7, %s495_s8  ;;  %p501_p12 = scmp.lt.s32.totalorder %s495_s8, %s495_s8 }
  0x1f   :  { %p502_p13 = por %p501_p12, %p500_p11 }
  0x21   :  { %p503_p0 = pnand %p502_p13, %p496_p10 }
  0x23   :  { %506 = shalt.err (!%p503_p0)
}
  0x24   :  { %50 = dma.hbm_to_vmem [thread:$0]  %s598_s3, 1024, %s45_s7, [#allocation6], %s534_s21, %s534_s21, %s535_s22  }
  0x25   :  { %527 = dma.done.wait [#allocation3], 512  }
  0x26   :  { %528 = vsyncadd [#allocation3], 4294966784 }
  0x27   :  { %529 = dma.done.wait [#allocation6], 2048  }
  0x28   :  { %530 = vsyncadd [#allocation6], 4294965248  ;;  %v423_v0 = vld [vmem:[#allocation5 + $0x38] sm:$0xff]   ;;  %v424_v1 = vld [vmem:[#allocation5 + $0x30] sm:$0xff]   ;;  %s540_s12 = smov [#allocation8]  }
  0x29   :  { %375 = vmatprep.subr.bf16.mxu0 %v423_v0  ;;  %v425_v2 = vld [vmem:[#allocation5 + $0x28] sm:$0xff]   ;;  %v426_v3 = vld [vmem:[#allocation5 + $0x20] sm:$0xff]   ;;  %v427_v7 = vld [vmem:[#allocation5 + $0x18] sm:$0xff]   ;;  %s324_s13 = sshll.u32 %s540_s12, 4  ;;  %s325_s13 = int_to_ptr.vmem [resolvable:$true] %s324_s13 }
  0x2a   :  { %376 = vmatpush3.bf16.msra.mxu0 %v423_v0  ;;  %v63_v4 = vld [vmem:[#allocation2] sm:$0xff]  ;;  %v64_v5 = vld [vmem:[#allocation2 + $0x8] sm:$0xff]  ;;  %v431_v8 = vld [vmem:[#allocation7 + $0x38] sm:$0xff]   ;;  %s507_s14 = scalar_lea.vmem %s325_s13, 512  ;;  %p512_p2 = scmp.lt.s32.totalorder %s325_s13, %s325_s13 }
  0x2b   :  { %377 = vmatprep.subr.bf16.mxu0 %v424_v1  ;;  %v67_v6 = vpack.c.bf16 %v64_v5, %v63_v4  ;;  %v432_v9 = vld [vmem:[#allocation7 + $0x30] sm:$0xff]   ;;  %395 = vmatprep.subr.bf16.mxu1 %v431_v8  ;;  %v429_v11 = vld [vmem:[#allocation5 + $0x8] sm:$0xff]   ;;  %v430_v12 = vld [vmem:[#allocation5] sm:$0xff]   ;;  %p508_p1 = scmp.ne.s32.totalorder %s325_s13, %s507_s14  ;;  %p513_p3 = scmp.lt.s32.totalorder %s507_s14, %s507_s14 }
  0x2c   :  { %396 = vmatpush3.bf16.msra.mxu1 %v431_v8  ;;  %v428_v10 = vld [vmem:[#allocation5 + $0x10] sm:$0xff]   ;;  %v66_v14 = vld [vmem:[#allocation2 + $0x18] sm:$0xff]  ;;  %v433_v16 = vld [vmem:[#allocation7 + $0x28] sm:$0xff]  }
  0x2d   :  { %391 = vmatprep.mubr.bf16.mxu0 %v67_v6  ;;  %397 = vmatprep.subr.bf16.mxu1 %v432_v9  ;;  %v65_v13 = vld [vmem:[#allocation2 + $0x10] sm:$0xff]  ;;  %v434_v17 = vld [vmem:[#allocation7 + $0x20] sm:$0xff]   ;;  %v435_v18 = vld [vmem:[#allocation7 + $0x18] sm:$0xff]   ;;  %p514_p4 = por %p513_p3, %p512_p2 }
  0x2e   :  { %378 = vmatpush3.bf16.msra.mxu0 %v424_v1  ;;  %v68_v15 = vpack.c.bf16 %v66_v14, %v65_v13  ;;  %v436_v19 = vld [vmem:[#allocation7 + $0x10] sm:$0xff]   ;;  %v437_v20 = vld [vmem:[#allocation7 + $0x8] sm:$0xff]   ;;  %v438_v21 = vld [vmem:[#allocation7] sm:$0xff]  }
  0x2f   :  { %379 = vmatprep.subr.bf16.mxu0 %v425_v2  ;;  %v337_v23 = vld [vmem:[%s597_s2] ss:$0 sm:$0xff]  ;;  %p515_p5 = pnand %p514_p4, %p508_p1 }
  0x30   :  { %398 = vmatpush3.bf16.msra.mxu1 %v432_v9  ;;  %v346_v37 = vld [vmem:[%s599_s4] ss:$0 sm:$0xff] }
  0x31   :  { %399 = vmatprep.subr.bf16.mxu1 %v433_v16 }
  0x32   :  { %380 = vmatpush3.bf16.msra.mxu0 %v425_v2 }
  0x33   :  { %381 = vmatprep.subr.bf16.mxu0 %v426_v3 }
  0x34   :  { %400 = vmatpush3.bf16.msra.mxu1 %v433_v16 }
  0x35   :  { %401 = vmatprep.subr.bf16.mxu1 %v434_v17 }
  0x36   :  { %382 = vmatpush3.bf16.msra.mxu0 %v426_v3 }
  0x37   :  { %383 = vmatprep.subr.bf16.mxu0 %v427_v7 }
  0x38   :  { %402 = vmatpush3.bf16.msra.mxu1 %v434_v17 }
  0x39   :  { %403 = vmatprep.subr.bf16.mxu1 %v435_v18 }
  0x3a   :  { %384 = vmatpush3.bf16.msra.mxu0 %v427_v7 }
  0x3b   :  { %385 = vmatprep.subr.bf16.mxu0 %v428_v10 }
  0x3c   :  { %404 = vmatpush3.bf16.msra.mxu1 %v435_v18 }
  0x3d   :  { %405 = vmatprep.subr.bf16.mxu1 %v436_v19 }
  0x3e   :  { %386 = vmatpush3.bf16.msra.mxu0 %v428_v10 }
  0x3f   :  { %387 = vmatprep.subr.bf16.mxu0 %v429_v11 }
  0x40   :  { %406 = vmatpush3.bf16.msra.mxu1 %v436_v19 }
  0x41   :  { %407 = vmatprep.subr.bf16.mxu1 %v437_v20 }
  0x42   :  { %388 = vmatpush3.bf16.msra.mxu0 %v429_v11 }
  0x43   :  { %389 = vmatprep.subr.bf16.mxu0 %v430_v12 }
  0x44   :  { %408 = vmatpush3.bf16.msra.mxu1 %v437_v20 }
  0x45   :  { %409 = vmatprep.subr.bf16.mxu1 %v438_v21 }
  0x46   :  { %390 = vmatpush3.bf16.msra.mxu0 %v430_v12 }
  0x48   :  { %410 = vmatpush3.bf16.msra.mxu1 %v438_v21 }
  0x49   :  { %392 = vmatmul.mubr.bf16.vlgmr.msra.gmra.mxu0 %v68_v15 }
 0x109   :  { %v393_v22 = vpop.f32.mrf.mxu0 }
 0x10a   :  { %v183_v28 = vadd.f32 %v393_v22, %v337_v23 }
 0x10b   :  { %v174_v24 = vpop.f32.mrf.mxu0 }
 0x10c   :  { %v175_v25 = vadd.f32 %v337_v23, %v174_v24 }
 0x10d   :  { %v394_v26 = vpop.f32.mrf.mxu0 }
 0x10e   :  { %v186_v27 = vadd.f32 %v394_v26, %v337_v23  ;;  %439 = vtanh.f32 %v175_v25 }
 0x10f   :  { %v177_v29 = vpop.f32.mrf.mxu0 }
 0x110   :  { %v178_v30 = vadd.f32 %v337_v23, %v177_v29  ;;  %441 = vtanh.f32 %v186_v27 }
 0x112   :  { %443 = vtanh.f32 %v178_v30 }
 0x113   :  { %445 = vtanh.f32 %v183_v28 }
 0x11b   :  { %v440_v31 = vpop.eup %439 }
 0x11d   :  { %v442_v32 = vpop.eup %441 }
 0x11f   :  { %v444_v33 = vpop.eup %443 }
 0x120   :  { %v446_v34 = vpop.eup %445  ;;  %v193_v35 = vpack.c.bf16 %v444_v33, %v440_v31 }
 0x121   :  { %v194_v36 = vpack.c.bf16 %v442_v32, %v446_v34 }
 0x122   :  { %411 = vmatprep.mubr.bf16.mxu1 %v193_v35 }
 0x123   :  { %412 = vmatmul.mubr.bf16.vlgmr.msra.gmra.mxu1 %v194_v36 }
 0x1e3   :  { %v413_v38 = vpop.f32.mrf.mxu1 }
 0x1e4   :  { %v309_v39 = vadd.f32 %v413_v38, %v346_v37 }
 0x1e5   :  { %v300_v40 = vpop.f32.mrf.mxu1 }
 0x1e6   :  { %317 = vst [vmem:[#allocation8 + $0x10] sm:$0xff] %v309_v39  ;;  %v301_v41 = vadd.f32 %v346_v37, %v300_v40 }
 0x1e7   :  { %v414_v42 = vpop.f32.mrf.mxu1 }
 0x1e8   :  { %315 = vst [vmem:[#allocation8] sm:$0xff] %v301_v41  ;;  %v312_v43 = vadd.f32 %v414_v42, %v346_v37 }
 0x1e9   :  { %v303_v44 = vpop.f32.mrf.mxu1 }
 0x1ea   :  { %318 = vst [vmem:[#allocation8 + $0x18] sm:$0xff] %v312_v43  ;;  %v304_v45 = vadd.f32 %v346_v37, %v303_v44 }
 0x1ec   :  { %316 = vst [vmem:[#allocation8 + $0x8] sm:$0xff] %v304_v45 }
 0x1ed   :  { %518 = shalt.err (!%p515_p5)
}
 0x1ee   :  { %330 = dma.vmem_to_hbm [thread:$0]  %s325_s13, 512, %s600_s5, [#allocation4], %s537_s28, %s537_s28, %s538_s29  }
 0x1ef   :  { %531 = dma.done.wait [#allocation4], 512  }
 0x1f0   :  { %532 = vsyncadd [#allocation4], 4294966784 }
 0x1f1   :  { %334 = vsyncpa [#allocation3], 1 }
 0x1f2   :  { %335 = vsyncpa [#allocation6], 1 }
 0x1f3   :  { %336 = vsyncpa [#allocation4], 1 }

</bundles_post_ra>
